<compile_context>
chip_gen: v7x
topology: tpu7x:2x2x1
jax: 0.10.0
libtpu: 0.0.40
codegen_flags: <defaults>
</compile_context>

<pallas_src>
import functools
import math

import numpy as np

import jax
import jax.numpy as jnp
from jax.experimental import pallas as pl
from jax.experimental.pallas import tpu as pltpu


# ---------------------------------------------------------------------------
# Pallas kernel: fused 3-layer MLP for one batch tile.
# ---------------------------------------------------------------------------
def _mlp_decoder_kernel(z_ref, w1_ref, b1_ref, w2_ref, b2_ref, w3_ref, b3_ref,
                        out_ref):
    # layer 0: Linear(dim_z -> h0) + tanh   (bf16 MXU operands, f32 accumulate)
    h = jnp.dot(z_ref[...], w1_ref[...], preferred_element_type=jnp.float32)
    h = jnp.tanh(h + b1_ref[...])

    # layer 1: Linear(h0 -> h1) + tanh
    h = jnp.dot(h.astype(w2_ref.dtype), w2_ref[...],
                preferred_element_type=jnp.float32)
    h = jnp.tanh(h + b2_ref[...])

    # layer 2 (final): Linear(h1 -> bin_rep_len), no activation
    o = jnp.dot(h.astype(w3_ref.dtype), w3_ref[...],
                preferred_element_type=jnp.float32)
    out_ref[...] = (o + b3_ref[...]).astype(out_ref.dtype)


# ---------------------------------------------------------------------------
# Hardware / tiling helpers.
# ---------------------------------------------------------------------------
def _round_up(x, m):
    return ((x + m - 1) // m) * m


def _vmem_capacity_bytes():
    """Physical VMEM per core; conservative 64 MiB (v7x) if undetectable."""
    try:
        info = pltpu.get_tpu_info()
        for attr in ("vmem_capacity_bytes", "vmem_size_bytes", "vmem_bytes",
                     "vmem_capacity"):
            v = getattr(info, attr, None)
            if v:
                return int(v)
    except Exception:
        pass
    return 64 * 1024 * 1024


def _pick_vmem_limit(cap_bytes):
    """Scoped VMEM limit with headroom for compiler-internal scratch."""
    if cap_bytes <= (80 << 20):           # v7x-like: 64 MiB physical
        limit = min(cap_bytes - (12 << 20), 52 << 20)
    else:                                  # v5e / v6e: 128 MiB physical
        limit = min(cap_bytes - (24 << 20), 104 << 20)
    return max(32 << 20, int(limit))


def _choose_tile_b(batch, dim_z, h0, h1, n_out, *, weight_bytes, z_itemsize,
                   out_itemsize, vmem_limit_bytes, single_buffer_weights,
                   ensure_two_steps, max_tile=512):
    """Batch tile: multiple of 8, as large as fits the VMEM budget."""
    weight_term = weight_bytes * (1 if single_buffer_weights else 2)
    budget = vmem_limit_bytes - weight_term - (2 << 20)  # headroom for scratch
    # Per batch-row VMEM cost:
    #   z tile (2 pipeline buffers) + out tile (2 pipeline buffers)
    #   + f32 hidden activations and their bf16 casts
    #   + f32 matmul result and the (o + b3) temp before the store.
    per_row = (2 * dim_z * z_itemsize
               + 2 * n_out * out_itemsize
               + (h0 + h1) * (4 + 2)
               + 2 * n_out * 4)
    tile = budget // per_row if budget > 0 else 8
    tile = max(8, min(max_tile, (tile // 8) * 8))
    tile = min(tile, _round_up(batch, 8))
    if ensure_two_steps and _round_up(batch, 8) >= 16:
        # v7x has 2 TensorCores: make sure there are >= 2 grid steps to shard.
        tile = min(tile, _round_up(-(-batch // 2), 8))
    return int(tile)


# ---------------------------------------------------------------------------
# Parameter preparation (hoisted out of the per-call path: do this ONCE).
# ---------------------------------------------------------------------------
def prepare_params(params, *, use_bf16_matmul=True):
    """Cast weights to the matmul dtype and biases to f32 row vectors."""
    w1, b1, w2, b2, w3, b3 = params
    mm_dtype = jnp.bfloat16 if use_bf16_matmul else jnp.float32
    prep_w = lambda w: jnp.asarray(w, mm_dtype)
    prep_b = lambda b: jnp.asarray(b, jnp.float32).reshape(1, -1)
    return (prep_w(w1), prep_b(b1), prep_w(w2), prep_b(b2),
            prep_w(w3), prep_b(b3))


# ---------------------------------------------------------------------------
# Jitted forward implementation.
# ---------------------------------------------------------------------------
@functools.partial(
    jax.jit,
    static_argnames=("seq_len", "num_aa_types", "out_dtype", "tile_b",
                     "vmem_limit_bytes", "single_buffer_weights"))
def _forward_impl(z, w1, b1, w2, b2, w3, b3, *, seq_len, num_aa_types,
                  out_dtype, tile_b, vmem_limit_bytes, single_buffer_weights):
    batch, dim_z = z.shape
    h0 = w1.shape[1]
    h1 = w2.shape[1]
    n_out = w3.shape[1]

    padded_batch = _round_up(batch, tile_b)
    zc = z.astype(w1.dtype)
    if padded_batch != batch:
        zc = jnp.pad(zc, ((0, padded_batch - batch), (0, 0)))

    grid = (padded_batch // tile_b,)

    const = lambda i: (0, 0)
    if single_buffer_weights:
        # Constant blocks never change across grid steps -> 1 buffer is enough.
        wspec = lambda shape: pl.BlockSpec(shape, const,
                                           pipeline_mode=pl.Buffered(1))
    else:
        wspec = lambda shape: pl.BlockSpec(shape, const)

    in_specs = [
        pl.BlockSpec((tile_b, dim_z), lambda i: (i, 0)),   # z tile (pipelined)
        wspec((dim_z, h0)),                                # w1 (resident)
        wspec((1, h0)),                                    # b1
        wspec((h0, h1)),                                   # w2
        wspec((1, h1)),                                    # b2
        wspec((h1, n_out)),                                # w3
        wspec((1, n_out)),                                 # b3
    ]
    out_specs = pl.BlockSpec((tile_b, n_out), lambda i: (i, 0))

    weight_bytes = sum(int(a.size) * a.dtype.itemsize
                       for a in (w1, b1, w2, b2, w3, b3))
    out_bytes = padded_batch * n_out * np.dtype(out_dtype).itemsize
    cost = pl.CostEstimate(
        flops=2 * padded_batch * (dim_z * h0 + h0 * h1 + h1 * n_out),
        transcendentals=padded_batch * (h0 + h1),
        bytes_accessed=int(zc.size) * zc.dtype.itemsize + weight_bytes
                       + out_bytes,
    )

    out_padded = pl.pallas_call(
        _mlp_decoder_kernel,
        out_shape=jax.ShapeDtypeStruct((padded_batch, n_out), out_dtype),
        grid=grid,
        in_specs=in_specs,
        out_specs=out_specs,
        compiler_params=pltpu.CompilerParams(
            dimension_semantics=("parallel",),
            vmem_limit_bytes=int(vmem_limit_bytes),
        ),
        cost_estimate=cost,
    )(zc, w1, b1, w2, b2, w3, b3)

    # PyTorch view chain: view(-1, seq_len, num_aa_types).view(-1, num_aa_types)
    out = out_padded[:batch]
    return out.reshape(-1, seq_len, num_aa_types).reshape(-1, num_aa_types)


# ---------------------------------------------------------------------------
# Public wrapper: picks tiling / VMEM limit per generation, handles fallback.
# ---------------------------------------------------------------------------
def mlp_decoder2_forward(z, prepared_params, *, seq_len, num_aa_types,
                         out_dtype=jnp.float32):
    w1, b1, w2, b2, w3, b3 = prepared_params
    batch, dim_z = z.shape
    h0, h1, n_out = w1.shape[1], w2.shape[1], w3.shape[1]
    assert n_out == seq_len * num_aa_types

    cap = _vmem_capacity_bytes()
    vmem_limit = _pick_vmem_limit(cap)
    ensure_two = cap <= (80 << 20)   # v7x-like part -> feed both TensorCores

    weight_bytes = sum(int(a.size) * a.dtype.itemsize
                       for a in (w1, b1, w2, b2, w3, b3))
    z_itemsize = np.dtype(w1.dtype).itemsize
    out_itemsize = np.dtype(out_dtype).itemsize

    last_err = None
    for single_buf in (True, False):   # fall back if Buffered(1) is rejected
        tile_b = _choose_tile_b(
            batch, dim_z, h0, h1, n_out,
            weight_bytes=weight_bytes, z_itemsize=z_itemsize,
            out_itemsize=out_itemsize, vmem_limit_bytes=vmem_limit,
            single_buffer_weights=single_buf, ensure_two_steps=ensure_two)
        try:
            return _forward_impl(
                z, w1, b1, w2, b2, w3, b3,
                seq_len=seq_len, num_aa_types=num_aa_types,
                out_dtype=out_dtype, tile_b=tile_b,
                vmem_limit_bytes=vmem_limit,
                single_buffer_weights=single_buf)
        except Exception as e:   # pragma: no cover - version-skew fallback
            last_err = e
    raise last_err


# ---------------------------------------------------------------------------
# Deterministic parameter init (matches nn.Linear's U(-1/sqrt(fan_in), +)).
# ---------------------------------------------------------------------------
def init_params(key, dim_z, hidden_units, bin_rep_len, dtype=jnp.float32):
    # Layer structure implied by __init__:
    #   Linear(dim_z, hidden_units[0])
    #   Linear(hidden_units[0], hidden_units[1])
    #   Linear(hidden_units[-1], bin_rep_len)
    dims = [(dim_z, hidden_units[0]),
            (hidden_units[0], hidden_units[1]),
            (hidden_units[-1], bin_rep_len)]
    params = []
    for (fan_in, fan_out) in dims:
        key, kw, kb = jax.random.split(key, 3)
        bound = 1.0 / math.sqrt(fan_in)
        w = jax.random.uniform(kw, (fan_in, fan_out), dtype, -bound, bound)
        b = jax.random.uniform(kb, (1, fan_out), dtype, -bound, bound)
        params.extend([w, b])
    return tuple(params)


def _reference(z, params, seq_len, num_aa_types):
    w1, b1, w2, b2, w3, b3 = params
    h = jnp.tanh(z @ w1 + b1)
    h = jnp.tanh(h @ w2 + b2)
    out = h @ w3 + b3
    return out.reshape(-1, seq_len, num_aa_types).reshape(-1, num_aa_types)


if __name__ == "__main__":
    # Case 1: bin_rep_len = 128 (lane-dense fast path), tiny batch.
    batch = 2
    dim_z = 16
    hidden_units = (32, 32)
    seq_len = 8
    num_aa_types = 16
    bin_rep_len = seq_len * num_aa_types   # 128

    key = jax.random.PRNGKey(0)
    key, kz = jax.random.split(key)
    z = jax.random.normal(kz, (batch, dim_z), dtype=jnp.float32)
    params = init_params(key, dim_z, hidden_units, bin_rep_len)
    prepared = prepare_params(params)   # one-time bf16 cast (hoisted out of jit)

    out = mlp_decoder2_forward(z, prepared, seq_len=seq_len,
                               num_aa_types=num_aa_types)
    out = jax.block_until_ready(out)

    ref = _reference(z, params, seq_len, num_aa_types)
    assert out.shape == (batch * seq_len, num_aa_types), out.shape
    assert jnp.allclose(out, ref, atol=3e-2, rtol=3e-2), \
        float(jnp.max(jnp.abs(out - ref)))

    # Case 2: bin_rep_len % 128 != 0 (direct unpadded in-kernel store) and a
    # batch that needs padding to the tile size.
    seq_len2, num_aa2, batch2 = 5, 21, 3
    brl2 = seq_len2 * num_aa2   # 105
    key, kz2, kp2 = jax.random.split(key, 3)
    z2 = jax.random.normal(kz2, (batch2, dim_z), dtype=jnp.float32)
    params2 = init_params(kp2, dim_z, hidden_units, brl2)
    prepared2 = prepare_params(params2)

    out2 = jax.block_until_ready(
        mlp_decoder2_forward(z2, prepared2, seq_len=seq_len2,
                             num_aa_types=num_aa2))
    ref2 = _reference(z2, params2, seq_len2, num_aa2)
    assert out2.shape == (batch2 * seq_len2, num_aa2), out2.shape
    assert jnp.allclose(out2, ref2, atol=3e-2, rtol=3e-2), \
        float(jnp.max(jnp.abs(out2 - ref2)))

    print("KERNEL_OK")
</pallas_src>

<mosaic_0001>
module attributes {stable_mosaic.version = 11 : i64} {
  func.func @_mlp_decoder_kernel(%arg0: i32, %arg1: memref<8x16xbf16, #tpu.memory_space<vmem>>, %arg2: memref<16x32xbf16, #tpu.memory_space<vmem>>, %arg3: memref<1x32xf32, #tpu.memory_space<vmem>>, %arg4: memref<32x32xbf16, #tpu.memory_space<vmem>>, %arg5: memref<1x32xf32, #tpu.memory_space<vmem>>, %arg6: memref<32x128xbf16, #tpu.memory_space<vmem>>, %arg7: memref<1x128xf32, #tpu.memory_space<vmem>>, %arg8: memref<8x128xf32, #tpu.memory_space<vmem>>) attributes {dimension_semantics = [#tpu.dimension_semantics<parallel>], iteration_bounds = array<i64: 1>, scalar_prefetch = 0 : i64, scratch_operands = 0 : i64, tpu.core_type = #tpu.core_type<tc>, window_params = [{transform_indices = @transform_0, window_bounds = array<i64: 8, 16>}, {pipeline_mode = #tpu.pipeline_mode<synchronous>, transform_indices = @transform_1, window_bounds = array<i64: 16, 32>}, {pipeline_mode = #tpu.pipeline_mode<synchronous>, transform_indices = @transform_2, window_bounds = array<i64: 1, 32>}, {pipeline_mode = #tpu.pipeline_mode<synchronous>, transform_indices = @transform_3, window_bounds = array<i64: 32, 32>}, {pipeline_mode = #tpu.pipeline_mode<synchronous>, transform_indices = @transform_4, window_bounds = array<i64: 1, 32>}, {pipeline_mode = #tpu.pipeline_mode<synchronous>, transform_indices = @transform_5, window_bounds = array<i64: 32, 128>}, {pipeline_mode = #tpu.pipeline_mode<synchronous>, transform_indices = @transform_6, window_bounds = array<i64: 1, 128>}, {transform_indices = @transform_7, window_bounds = array<i64: 8, 128>}]} {
    %c0 = arith.constant 0 : index
    %c0_0 = arith.constant 0 : index
    %0 = vector.load %arg1[%c0, %c0_0] : memref<8x16xbf16, #tpu.memory_space<vmem>>, vector<8x16xbf16>
    %c0_1 = arith.constant 0 : index
    %c0_2 = arith.constant 0 : index
    %1 = vector.load %arg2[%c0_1, %c0_2] : memref<16x32xbf16, #tpu.memory_space<vmem>>, vector<16x32xbf16>
    %cst = arith.constant dense<0.000000e+00> : vector<8x32xf32>
    %2 = tpu.matmul %0, %1, %cst {dimension_numbers = #tpu.dot_dimension_numbers<[1], [0], [0], [1], [0, 0, 1, 1], [], []>} : vector<8x16xbf16>, vector<16x32xbf16>, vector<8x32xf32> -> vector<8x32xf32>
    %c0_3 = arith.constant 0 : index
    %c0_4 = arith.constant 0 : index
    %3 = vector.load %arg3[%c0_3, %c0_4] : memref<1x32xf32, #tpu.memory_space<vmem>>, vector<1x32xf32>
    %4 = vector.broadcast %3 : vector<1x32xf32> to vector<8x32xf32>
    %5 = arith.addf %2, %4 : vector<8x32xf32>
    %6 = math.tanh %5 : vector<8x32xf32>
    %7 = arith.truncf %6 : vector<8x32xf32> to vector<8x32xbf16>
    %c0_5 = arith.constant 0 : index
    %c0_6 = arith.constant 0 : index
    %8 = vector.load %arg4[%c0_5, %c0_6] : memref<32x32xbf16, #tpu.memory_space<vmem>>, vector<32x32xbf16>
    %cst_7 = arith.constant dense<0.000000e+00> : vector<8x32xf32>
    %9 = tpu.matmul %7, %8, %cst_7 {dimension_numbers = #tpu.dot_dimension_numbers<[1], [0], [0], [1], [0, 0, 1, 1], [], []>} : vector<8x32xbf16>, vector<32x32xbf16>, vector<8x32xf32> -> vector<8x32xf32>
    %c0_8 = arith.constant 0 : index
    %c0_9 = arith.constant 0 : index
    %10 = vector.load %arg5[%c0_8, %c0_9] : memref<1x32xf32, #tpu.memory_space<vmem>>, vector<1x32xf32>
    %11 = vector.broadcast %10 : vector<1x32xf32> to vector<8x32xf32>
    %12 = arith.addf %9, %11 : vector<8x32xf32>
    %13 = math.tanh %12 : vector<8x32xf32>
    %14 = arith.truncf %13 : vector<8x32xf32> to vector<8x32xbf16>
    %c0_10 = arith.constant 0 : index
    %c0_11 = arith.constant 0 : index
    %15 = vector.load %arg6[%c0_10, %c0_11] : memref<32x128xbf16, #tpu.memory_space<vmem>>, vector<32x128xbf16>
    %cst_12 = arith.constant dense<0.000000e+00> : vector<8x128xf32>
    %16 = tpu.matmul %14, %15, %cst_12 {dimension_numbers = #tpu.dot_dimension_numbers<[1], [0], [0], [1], [0, 0, 1, 1], [], []>} : vector<8x32xbf16>, vector<32x128xbf16>, vector<8x128xf32> -> vector<8x128xf32>
    %c0_13 = arith.constant 0 : index
    %c0_14 = arith.constant 0 : index
    %17 = vector.load %arg7[%c0_13, %c0_14] : memref<1x128xf32, #tpu.memory_space<vmem>>, vector<1x128xf32>
    %18 = vector.broadcast %17 : vector<1x128xf32> to vector<8x128xf32>
    %19 = arith.addf %16, %18 : vector<8x128xf32>
    %c0_15 = arith.constant 0 : index
    %c0_16 = arith.constant 0 : index
    %20 = vector.load %arg8[%c0_15, %c0_16] : memref<8x128xf32, #tpu.memory_space<vmem>>, vector<8x128xf32>
    tpu.vector_store %arg8[%c0_15, %c0_16], %19 {strides = array<i32>} : memref<8x128xf32, #tpu.memory_space<vmem>>, vector<8x128xf32>,
    return
  }
  func.func @transform_0(%arg0: i32) -> (i32, i32) {
    %c0_i32 = arith.constant 0 : i32
    %c0_i32_0 = arith.constant 0 : i32
    return %arg0, %c0_i32 : i32, i32
  }
  func.func @transform_1(%arg0: i32) -> (i32, i32) {
    %c0_i32 = arith.constant 0 : i32
    %c0_i32_0 = arith.constant 0 : i32
    %c0_i32_1 = arith.constant 0 : i32
    return %c0_i32, %c0_i32_0 : i32, i32
  }
  func.func @transform_2(%arg0: i32) -> (i32, i32) {
    %c0_i32 = arith.constant 0 : i32
    %c0_i32_0 = arith.constant 0 : i32
    %c0_i32_1 = arith.constant 0 : i32
    return %c0_i32, %c0_i32_0 : i32, i32
  }
  func.func @transform_3(%arg0: i32) -> (i32, i32) {
    %c0_i32 = arith.constant 0 : i32
    %c0_i32_0 = arith.constant 0 : i32
    %c0_i32_1 = arith.constant 0 : i32
    return %c0_i32, %c0_i32_0 : i32, i32
  }
  func.func @transform_4(%arg0: i32) -> (i32, i32) {
    %c0_i32 = arith.constant 0 : i32
    %c0_i32_0 = arith.constant 0 : i32
    %c0_i32_1 = arith.constant 0 : i32
    return %c0_i32, %c0_i32_0 : i32, i32
  }
  func.func @transform_5(%arg0: i32) -> (i32, i32) {
    %c0_i32 = arith.constant 0 : i32
    %c0_i32_0 = arith.constant 0 : i32
    %c0_i32_1 = arith.constant 0 : i32
    return %c0_i32, %c0_i32_0 : i32, i32
  }
  func.func @transform_6(%arg0: i32) -> (i32, i32) {
    %c0_i32 = arith.constant 0 : i32
    %c0_i32_0 = arith.constant 0 : i32
    %c0_i32_1 = arith.constant 0 : i32
    return %c0_i32, %c0_i32_0 : i32, i32
  }
  func.func @transform_7(%arg0: i32) -> (i32, i32) {
    %c0_i32 = arith.constant 0 : i32
    %c0_i32_0 = arith.constant 0 : i32
    return %arg0, %c0_i32 : i32, i32
  }
}

module attributes {stable_mosaic.version = 11 : i64} {
  func.func @_mlp_decoder_kernel(%arg0: i32, %arg1: memref<8x16xbf16, #tpu.memory_space<vmem>>, %arg2: memref<16x32xbf16, #tpu.memory_space<vmem>>, %arg3: memref<1x32xf32, #tpu.memory_space<vmem>>, %arg4: memref<32x32xbf16, #tpu.memory_space<vmem>>, %arg5: memref<1x32xf32, #tpu.memory_space<vmem>>, %arg6: memref<32x128xbf16, #tpu.memory_space<vmem>>, %arg7: memref<1x128xf32, #tpu.memory_space<vmem>>, %arg8: memref<8x128xf32, #tpu.memory_space<vmem>>) attributes {dimension_semantics = [#tpu.dimension_semantics<parallel>], iteration_bounds = array<i64: 1>, scalar_prefetch = 0 : i64, scratch_operands = 0 : i64, tpu.core_type = #tpu.core_type<tc>, window_params = [{transform_indices = @transform_0, window_bounds = array<i64: 8, 16>}, {pipeline_mode = #tpu.pipeline_mode<synchronous>, transform_indices = @transform_1, window_bounds = array<i64: 16, 32>}, {pipeline_mode = #tpu.pipeline_mode<synchronous>, transform_indices = @transform_2, window_bounds = array<i64: 1, 32>}, {pipeline_mode = #tpu.pipeline_mode<synchronous>, transform_indices = @transform_3, window_bounds = array<i64: 32, 32>}, {pipeline_mode = #tpu.pipeline_mode<synchronous>, transform_indices = @transform_4, window_bounds = array<i64: 1, 32>}, {pipeline_mode = #tpu.pipeline_mode<synchronous>, transform_indices = @transform_5, window_bounds = array<i64: 32, 128>}, {pipeline_mode = #tpu.pipeline_mode<synchronous>, transform_indices = @transform_6, window_bounds = array<i64: 1, 128>}, {transform_indices = @transform_7, window_bounds = array<i64: 8, 128>}]} {
    %c0 = arith.constant 0 : index
    %c0_0 = arith.constant 0 : index
    %0 = vector.load %arg1[%c0, %c0_0] : memref<8x16xbf16, #tpu.memory_space<vmem>>, vector<8x16xbf16>
    %c0_1 = arith.constant 0 : index
    %c0_2 = arith.constant 0 : index
    %1 = vector.load %arg2[%c0_1, %c0_2] : memref<16x32xbf16, #tpu.memory_space<vmem>>, vector<16x32xbf16>
    %cst = arith.constant dense<0.000000e+00> : vector<8x32xf32>
    %2 = tpu.matmul %0, %1, %cst {dimension_numbers = #tpu.dot_dimension_numbers<[1], [0], [0], [1], [0, 0, 1, 1], [], []>} : vector<8x16xbf16>, vector<16x32xbf16>, vector<8x32xf32> -> vector<8x32xf32>
    %c0_3 = arith.constant 0 : index
    %c0_4 = arith.constant 0 : index
    %3 = vector.load %arg3[%c0_3, %c0_4] : memref<1x32xf32, #tpu.memory_space<vmem>>, vector<1x32xf32>
    %4 = vector.broadcast %3 : vector<1x32xf32> to vector<8x32xf32>
    %5 = arith.addf %2, %4 : vector<8x32xf32>
    %6 = math.tanh %5 : vector<8x32xf32>
    %7 = arith.truncf %6 : vector<8x32xf32> to vector<8x32xbf16>
    %c0_5 = arith.constant 0 : index
    %c0_6 = arith.constant 0 : index
    %8 = vector.load %arg4[%c0_5, %c0_6] : memref<32x32xbf16, #tpu.memory_space<vmem>>, vector<32x32xbf16>
    %cst_7 = arith.constant dense<0.000000e+00> : vector<8x32xf32>
    %9 = tpu.matmul %7, %8, %cst_7 {dimension_numbers = #tpu.dot_dimension_numbers<[1], [0], [0], [1], [0, 0, 1, 1], [], []>} : vector<8x32xbf16>, vector<32x32xbf16>, vector<8x32xf32> -> vector<8x32xf32>
    %c0_8 = arith.constant 0 : index
    %c0_9 = arith.constant 0 : index
    %10 = vector.load %arg5[%c0_8, %c0_9] : memref<1x32xf32, #tpu.memory_space<vmem>>, vector<1x32xf32>
    %11 = vector.broadcast %10 : vector<1x32xf32> to vector<8x32xf32>
    %12 = arith.addf %9, %11 : vector<8x32xf32>
    %13 = math.tanh %12 : vector<8x32xf32>
    %14 = arith.truncf %13 : vector<8x32xf32> to vector<8x32xbf16>
    %c0_10 = arith.constant 0 : index
    %c0_11 = arith.constant 0 : index
    %15 = vector.load %arg6[%c0_10, %c0_11] : memref<32x128xbf16, #tpu.memory_space<vmem>>, vector<32x128xbf16>
    %cst_12 = arith.constant dense<0.000000e+00> : vector<8x128xf32>
    %16 = tpu.matmul %14, %15, %cst_12 {dimension_numbers = #tpu.dot_dimension_numbers<[1], [0], [0], [1], [0, 0, 1, 1], [], []>} : vector<8x32xbf16>, vector<32x128xbf16>, vector<8x128xf32> -> vector<8x128xf32>
    %c0_13 = arith.constant 0 : index
    %c0_14 = arith.constant 0 : index
    %17 = vector.load %arg7[%c0_13, %c0_14] : memref<1x128xf32, #tpu.memory_space<vmem>>, vector<1x128xf32>
    %18 = vector.broadcast %17 : vector<1x128xf32> to vector<8x128xf32>
    %19 = arith.addf %16, %18 : vector<8x128xf32>
    %c0_15 = arith.constant 0 : index
    %c0_16 = arith.constant 0 : index
    %20 = vector.load %arg8[%c0_15, %c0_16] : memref<8x128xf32, #tpu.memory_space<vmem>>, vector<8x128xf32>
    tpu.vector_store %arg8[%c0_15, %c0_16], %19 {strides = array<i32>} : memref<8x128xf32, #tpu.memory_space<vmem>>, vector<8x128xf32>,
    return
  }
  func.func @transform_0(%arg0: i32) -> (i32, i32) {
    %c0_i32 = arith.constant 0 : i32
    %c0_i32_0 = arith.constant 0 : i32
    return %arg0, %c0_i32 : i32, i32
  }
  func.func @transform_1(%arg0: i32) -> (i32, i32) {
    %c0_i32 = arith.constant 0 : i32
    %c0_i32_0 = arith.constant 0 : i32
    %c0_i32_1 = arith.constant 0 : i32
    return %c0_i32, %c0_i32_0 : i32, i32
  }
  func.func @transform_2(%arg0: i32) -> (i32, i32) {
    %c0_i32 = arith.constant 0 : i32
    %c0_i32_0 = arith.constant 0 : i32
    %c0_i32_1 = arith.constant 0 : i32
    return %c0_i32, %c0_i32_0 : i32, i32
  }
  func.func @transform_3(%arg0: i32) -> (i32, i32) {
    %c0_i32 = arith.constant 0 : i32
    %c0_i32_0 = arith.constant 0 : i32
    %c0_i32_1 = arith.constant 0 : i32
    return %c0_i32, %c0_i32_0 : i32, i32
  }
  func.func @transform_4(%arg0: i32) -> (i32, i32) {
    %c0_i32 = arith.constant 0 : i32
    %c0_i32_0 = arith.constant 0 : i32
    %c0_i32_1 = arith.constant 0 : i32
    return %c0_i32, %c0_i32_0 : i32, i32
  }
  func.func @transform_5(%arg0: i32) -> (i32, i32) {
    %c0_i32 = arith.constant 0 : i32
    %c0_i32_0 = arith.constant 0 : i32
    %c0_i32_1 = arith.constant 0 : i32
    return %c0_i32, %c0_i32_0 : i32, i32
  }
  func.func @transform_6(%arg0: i32) -> (i32, i32) {
    %c0_i32 = arith.constant 0 : i32
    %c0_i32_0 = arith.constant 0 : i32
    %c0_i32_1 = arith.constant 0 : i32
    return %c0_i32, %c0_i32_0 : i32, i32
  }
  func.func @transform_7(%arg0: i32) -> (i32, i32) {
    %c0_i32 = arith.constant 0 : i32
    %c0_i32_0 = arith.constant 0 : i32
    return %arg0, %c0_i32 : i32, i32
  }
}

</mosaic_0001>

<bundles_post_ra>
// kernel: _forward_impl.1
= control target key start
LH: loop header
LB: loop body
LE: loop exit
PB: predicated region body
PF: predicated region fallthrough
CT: control target
= control target key end

     0   :  { %12 = vsyncpa [#allocation3], 0  ;;  %s456_s0 = inlined_call_operand.vmem [shape: bf16[8,16], index: 0, kind: input, shape index: {}]   ;;  %s457_s1 = inlined_call_operand.hbm [shape: bf16[16,32], index: 1, kind: input, shape index: {}]   ;;  %s458_s2 = inlined_call_operand.vmem [shape: f32[1,32], index: 2, kind: input, shape index: {}]   ;;  %s459_s3 = inlined_call_operand.vmem [shape: bf16[32,32], index: 3, kind: input, shape index: {}]   ;;  %s460_s4 = inlined_call_operand.vmem [shape: f32[1,32], index: 4, kind: input, shape index: {}]   ;;  %s461_s5 = inlined_call_operand.hbm [shape: bf16[32,128], index: 5, kind: input, shape index: {}]   ;;  %s462_s6 = inlined_call_operand.vmem [shape: f32[1,128], index: 6, kind: input, shape index: {}]   ;;  %s463_s7 = inlined_call_operand.vmem [shape: f32[8,128], index: 7, kind: output, shape index: {}]  }
   0x1   :  { %13 = vsyncpa [#allocation5], 0  ;;  %s363_s24 = smov [#allocation2]   ;;  %s315_s28 = scalar_lea.hbm %s457_s1, 128 }
   0x2   :  { %s21_s25 = sshll.u32 %s363_s24, 4  ;;  %p316_p0 = scmp.ne.s32.totalorder %s457_s1, %s315_s28  ;;  %s22_s25 = int_to_ptr.vmem [resolvable:$true] %s21_s25 }
   0x3   :  { %p319_p1 = scmp.lt.u32.totalorder %s315_s28, %s457_s1 }
   0x5   :  { %p321_p2 = pnand %p319_p1, %p316_p0 }
   0x7   :  { %324 = shalt.err (!%p321_p2)
}
   0x8   :  { %s325_s10 = scalar_lea.vmem %s22_s25, 128  ;;  %p330_p4 = scmp.lt.s32.totalorder %s22_s25, %s22_s25 }
   0x9   :  { %p326_p3 = scmp.ne.s32.totalorder %s22_s25, %s325_s10  ;;  %p331_p5 = scmp.lt.s32.totalorder %s325_s10, %s325_s10 }
   0xb   :  { %p332_p6 = por %p331_p5, %p330_p4 }
   0xd   :  { %p333_p7 = pnand %p332_p6, %p326_p3 }
   0xf   :  { %336 = shalt.err (!%p333_p7)
}
  0x10   :  { %s364_s11 = smov 64   ;;  %s365_s12 = smov 4  }
  0x11   :  { %27 = dma.hbm_to_vmem [thread:$0]  %s457_s1, 128, %s22_s25, [#allocation3], %s364_s11, %s364_s11, %s365_s12  }
  0x12   :  { %s366_s15 = smov [#allocation4]   ;;  %s337_s19 = scalar_lea.hbm %s461_s5, 256 }
  0x13   :  { %s39_s16 = sshll.u32 %s366_s15, 4  ;;  %p338_p8 = scmp.ne.s32.totalorder %s461_s5, %s337_s19  ;;  %s40_s16 = int_to_ptr.vmem [resolvable:$true] %s39_s16 }
  0x14   :  { %p341_p9 = scmp.lt.u32.totalorder %s337_s19, %s461_s5 }
  0x16   :  { %p343_p10 = pnand %p341_p9, %p338_p8 }
  0x18   :  { %346 = shalt.err (!%p343_p10)
}
  0x19   :  { %s347_s24 = scalar_lea.vmem %s40_s16, 256  ;;  %p352_p12 = scmp.lt.s32.totalorder %s40_s16, %s40_s16 }
  0x1a   :  { %p348_p11 = scmp.ne.s32.totalorder %s40_s16, %s347_s24  ;;  %p353_p13 = scmp.lt.s32.totalorder %s347_s24, %s347_s24 }
  0x1c   :  { %p354_p0 = por %p353_p13, %p352_p12 }
  0x1e   :  { %p355_p1 = pnand %p354_p0, %p348_p11 }
  0x20   :  { %358 = shalt.err (!%p355_p1)
}
  0x21   :  { %45 = dma.hbm_to_vmem [thread:$0]  %s461_s5, 256, %s40_s16, [#allocation5], %s364_s11, %s364_s11, %s365_s12  }
  0x22   :  { %359 = dma.done.wait [#allocation3], 128  }
  0x23   :  { %360 = vsyncadd [#allocation3], 4294967168 }
  0x24   :  { %361 = dma.done.wait [#allocation5], 256  }
  0x25   :  { %362 = vsyncadd [#allocation5], 4294967040  ;;  %v367_v0 = vmov 0.0   ;;  %vm368_vm0 = vmmov 0   ;;  %v306_v1 = vld [vmem:[#allocation2] sm:$0xff]   ;;  %vm71_vm1 = vcmask 130048  }
  0x26   :  { %278 = vmatprep.subr.bf16.mxu0 %v367_v0  ;;  %280 = vmatprep.mubr.msk.bf16.mxu0 %vm368_vm0, %v367_v0  ;;  %v55_v2 = vld [vmem:[%s456_s0] sm:$0xf]  ;;  %v308_v4 = vld [vmem:[%s459_s3 + $0x8] sm:$0xff]   ;;  %vm140_vm2 = vcmask 261120   ;;  %v309_v13 = vld [vmem:[#allocation4] sm:$0xff]  }
  0x27   :  { %284 = vmatprep.subr.bf16.mxu1 %v367_v0  ;;  %288 = vmatprep.mubr.msk.bf16.mxu1 %vm368_vm0, %v367_v0  ;;  %v307_v3 = vld [vmem:[%s459_s3] sm:$0xff]  }
  0x28   :  { %279 = vmatpush3.bf16.msra.mxu0 %v306_v1  ;;  %285 = vmatpush3.bf16.msra.mxu1 %v307_v3  ;;  %v259_v5 = vld [vmem:[%s458_s2] ss:$0 sm:$0xff] }
  0x29   :  { %292 = vmatprep.subr.bf16.mxu0 %v367_v0  ;;  %286 = vmatprep.subr.bf16.mxu1 %v367_v0  ;;  %v310_v14 = vld [vmem:[#allocation4 + $0x8] sm:$0xff]  }
  0x2a   :  { %v262_v15 = vld [vmem:[%s460_s4] ss:$0 sm:$0xff] }
  0x2b   :  { %281 = vmatmul.mubr.msk.bf16.vlgmr.msra.gmra.mrb[0].mxu0 %vm71_vm1, %v55_v2  ;;  %v266_v23 = vld [vmem:[%s462_s6] ss:$0 sm:$0xff] }
  0x2c   :  { %296 = vmatprep.mubr.msk.bf16.mxu0 %vm368_vm0, %v367_v0  ;;  %287 = vmatpush3.bf16.msra.mxu1 %v308_v4 }
  0x2d   :  { %293 = vmatpush3.bf16.msra.mxu0 %v309_v13 }
  0x2e   :  { %294 = vmatprep.subr.bf16.mxu0 %v367_v0 }
  0x31   :  { %295 = vmatpush3.bf16.msra.mxu0 %v310_v14 }
  0xfe   :  { %v109_v6 = vpop.f32.mrb[0].mxu0 }
  0xff   :  { %v110_v7 = vadd.f32 %v259_v5, %v109_v6  ;;  %v282_v8 = vpop.f32.mrb[1].mxu0 }
 0x100   :  { %v112_v9 = vpop.f32.mrb[2].mxu0 }
 0x101   :  { %311 = vtanh.f32 %v110_v7  ;;  %v283_v10 = vpop.f32.mrb[3].mxu0 }
 0x10b   :  { %v312_v11 = vpop.eup %311 }
 0x10c   :  { %v116_v12 = vpack.c.bf16 %v312_v11, %v312_v11 }
 0x10e   :  { %289 = vmatmul.mubr.msk.bf16.vlgmr.msra.gmra.mrb[0].mxu1 %vm140_vm2, %v116_v12 }
 0x1e1   :  { %v178_v16 = vpop.f32.mrb[0].mxu1 }
 0x1e2   :  { %v179_v17 = vadd.f32 %v262_v15, %v178_v16  ;;  %v290_v18 = vpop.f32.mrb[1].mxu1 }
 0x1e3   :  { %v181_v19 = vpop.f32.mrb[2].mxu1 }
 0x1e4   :  { %313 = vtanh.f32 %v179_v17  ;;  %v291_v20 = vpop.f32.mrb[3].mxu1 }
 0x1ee   :  { %v314_v21 = vpop.eup %313 }
 0x1ef   :  { %v185_v22 = vpack.c.bf16 %v314_v21, %v314_v21 }
 0x1f1   :  { %297 = vmatmul.mubr.msk.bf16.vlgmr.msra.gmra.mrb[4].mxu0 %vm140_vm2, %v185_v22 }
 0x2c4   :  { %v246_v24 = vpop.f32.mrb[4].mxu0 }
 0x2c5   :  { %v247_v25 = vadd.f32 %v266_v23, %v246_v24  ;;  %v298_v26 = vpop.f32.mrb[5].mxu0 }
 0x2c6   :  { %v249_v27 = vpop.f32.mrb[6].mxu0 }
 0x2c7   :  { %252 = vst [vmem:[%s463_s7] sm:$0xff] %v247_v25  ;;  %v299_v28 = vpop.f32.mrb[7].mxu0 }
 0x2c8   :  { %257 = vsyncpa [#allocation3], 1 }
 0x2c9   :  { %258 = vsyncpa [#allocation5], 1 }

// kernel: _forward_impl.1
= control target key start
LH: loop header
LB: loop body
LE: loop exit
PB: predicated region body
PF: predicated region fallthrough
CT: control target
= control target key end

     0   :  { %12 = vsyncpa [#allocation3], 0  ;;  %s456_s0 = inlined_call_operand.vmem [shape: bf16[8,16], index: 0, kind: input, shape index: {}]   ;;  %s457_s1 = inlined_call_operand.hbm [shape: bf16[16,32], index: 1, kind: input, shape index: {}]   ;;  %s458_s2 = inlined_call_operand.vmem [shape: f32[1,32], index: 2, kind: input, shape index: {}]   ;;  %s459_s3 = inlined_call_operand.vmem [shape: bf16[32,32], index: 3, kind: input, shape index: {}]   ;;  %s460_s4 = inlined_call_operand.vmem [shape: f32[1,32], index: 4, kind: input, shape index: {}]   ;;  %s461_s5 = inlined_call_operand.hbm [shape: bf16[32,128], index: 5, kind: input, shape index: {}]   ;;  %s462_s6 = inlined_call_operand.vmem [shape: f32[1,128], index: 6, kind: input, shape index: {}]   ;;  %s463_s7 = inlined_call_operand.vmem [shape: f32[8,128], index: 7, kind: output, shape index: {}]  }
   0x1   :  { %13 = vsyncpa [#allocation5], 0  ;;  %s363_s24 = smov [#allocation2]   ;;  %s315_s28 = scalar_lea.hbm %s457_s1, 128 }
   0x2   :  { %s21_s25 = sshll.u32 %s363_s24, 4  ;;  %p316_p0 = scmp.ne.s32.totalorder %s457_s1, %s315_s28  ;;  %s22_s25 = int_to_ptr.vmem [resolvable:$true] %s21_s25 }
   0x3   :  { %p319_p1 = scmp.lt.u32.totalorder %s315_s28, %s457_s1 }
   0x5   :  { %p321_p2 = pnand %p319_p1, %p316_p0 }
   0x7   :  { %324 = shalt.err (!%p321_p2)
}
   0x8   :  { %s325_s10 = scalar_lea.vmem %s22_s25, 128  ;;  %p330_p4 = scmp.lt.s32.totalorder %s22_s25, %s22_s25 }
   0x9   :  { %p326_p3 = scmp.ne.s32.totalorder %s22_s25, %s325_s10  ;;  %p331_p5 = scmp.lt.s32.totalorder %s325_s10, %s325_s10 }
   0xb   :  { %p332_p6 = por %p331_p5, %p330_p4 }
   0xd   :  { %p333_p7 = pnand %p332_p6, %p326_p3 }
   0xf   :  { %336 = shalt.err (!%p333_p7)
}
  0x10   :  { %s364_s11 = smov 64   ;;  %s365_s12 = smov 4  }
  0x11   :  { %27 = dma.hbm_to_vmem [thread:$0]  %s457_s1, 128, %s22_s25, [#allocation3], %s364_s11, %s364_s11, %s365_s12  }
  0x12   :  { %s366_s15 = smov [#allocation4]   ;;  %s337_s19 = scalar_lea.hbm %s461_s5, 256 }
  0x13   :  { %s39_s16 = sshll.u32 %s366_s15, 4  ;;  %p338_p8 = scmp.ne.s32.totalorder %s461_s5, %s337_s19  ;;  %s40_s16 = int_to_ptr.vmem [resolvable:$true] %s39_s16 }
  0x14   :  { %p341_p9 = scmp.lt.u32.totalorder %s337_s19, %s461_s5 }
  0x16   :  { %p343_p10 = pnand %p341_p9, %p338_p8 }
  0x18   :  { %346 = shalt.err (!%p343_p10)
}
  0x19   :  { %s347_s24 = scalar_lea.vmem %s40_s16, 256  ;;  %p352_p12 = scmp.lt.s32.totalorder %s40_s16, %s40_s16 }
  0x1a   :  { %p348_p11 = scmp.ne.s32.totalorder %s40_s16, %s347_s24  ;;  %p353_p13 = scmp.lt.s32.totalorder %s347_s24, %s347_s24 }
  0x1c   :  { %p354_p0 = por %p353_p13, %p352_p12 }
  0x1e   :  { %p355_p1 = pnand %p354_p0, %p348_p11 }
  0x20   :  { %358 = shalt.err (!%p355_p1)
}
  0x21   :  { %45 = dma.hbm_to_vmem [thread:$0]  %s461_s5, 256, %s40_s16, [#allocation5], %s364_s11, %s364_s11, %s365_s12  }
  0x22   :  { %359 = dma.done.wait [#allocation3], 128  }
  0x23   :  { %360 = vsyncadd [#allocation3], 4294967168 }
  0x24   :  { %361 = dma.done.wait [#allocation5], 256  }
  0x25   :  { %362 = vsyncadd [#allocation5], 4294967040  ;;  %v367_v0 = vmov 0.0   ;;  %vm368_vm0 = vmmov 0   ;;  %v306_v1 = vld [vmem:[#allocation2] sm:$0xff]   ;;  %vm71_vm1 = vcmask 130048  }
  0x26   :  { %278 = vmatprep.subr.bf16.mxu0 %v367_v0  ;;  %280 = vmatprep.mubr.msk.bf16.mxu0 %vm368_vm0, %v367_v0  ;;  %v55_v2 = vld [vmem:[%s456_s0] sm:$0xf]  ;;  %v308_v4 = vld [vmem:[%s459_s3 + $0x8] sm:$0xff]   ;;  %vm140_vm2 = vcmask 261120   ;;  %v309_v13 = vld [vmem:[#allocation4] sm:$0xff]  }
  0x27   :  { %284 = vmatprep.subr.bf16.mxu1 %v367_v0  ;;  %288 = vmatprep.mubr.msk.bf16.mxu1 %vm368_vm0, %v367_v0  ;;  %v307_v3 = vld [vmem:[%s459_s3] sm:$0xff]  }
  0x28   :  { %279 = vmatpush3.bf16.msra.mxu0 %v306_v1  ;;  %285 = vmatpush3.bf16.msra.mxu1 %v307_v3  ;;  %v259_v5 = vld [vmem:[%s458_s2] ss:$0 sm:$0xff] }
  0x29   :  { %292 = vmatprep.subr.bf16.mxu0 %v367_v0  ;;  %286 = vmatprep.subr.bf16.mxu1 %v367_v0  ;;  %v310_v14 = vld [vmem:[#allocation4 + $0x8] sm:$0xff]  }
  0x2a   :  { %v262_v15 = vld [vmem:[%s460_s4] ss:$0 sm:$0xff] }
  0x2b   :  { %281 = vmatmul.mubr.msk.bf16.vlgmr.msra.gmra.mrb[0].mxu0 %vm71_vm1, %v55_v2  ;;  %v266_v23 = vld [vmem:[%s462_s6] ss:$0 sm:$0xff] }
  0x2c   :  { %296 = vmatprep.mubr.msk.bf16.mxu0 %vm368_vm0, %v367_v0  ;;  %287 = vmatpush3.bf16.msra.mxu1 %v308_v4 }
  0x2d   :  { %293 = vmatpush3.bf16.msra.mxu0 %v309_v13 }
  0x2e   :  { %294 = vmatprep.subr.bf16.mxu0 %v367_v0 }
  0x31   :  { %295 = vmatpush3.bf16.msra.mxu0 %v310_v14 }
  0xfe   :  { %v109_v6 = vpop.f32.mrb[0].mxu0 }
  0xff   :  { %v110_v7 = vadd.f32 %v259_v5, %v109_v6  ;;  %v282_v8 = vpop.f32.mrb[1].mxu0 }
 0x100   :  { %v112_v9 = vpop.f32.mrb[2].mxu0 }
 0x101   :  { %311 = vtanh.f32 %v110_v7  ;;  %v283_v10 = vpop.f32.mrb[3].mxu0 }
 0x10b   :  { %v312_v11 = vpop.eup %311 }
 0x10c   :  { %v116_v12 = vpack.c.bf16 %v312_v11, %v312_v11 }
 0x10e   :  { %289 = vmatmul.mubr.msk.bf16.vlgmr.msra.gmra.mrb[0].mxu1 %vm140_vm2, %v116_v12 }
 0x1e1   :  { %v178_v16 = vpop.f32.mrb[0].mxu1 }
 0x1e2   :  { %v179_v17 = vadd.f32 %v262_v15, %v178_v16  ;;  %v290_v18 = vpop.f32.mrb[1].mxu1 }
 0x1e3   :  { %v181_v19 = vpop.f32.mrb[2].mxu1 }
 0x1e4   :  { %313 = vtanh.f32 %v179_v17  ;;  %v291_v20 = vpop.f32.mrb[3].mxu1 }
 0x1ee   :  { %v314_v21 = vpop.eup %313 }
 0x1ef   :  { %v185_v22 = vpack.c.bf16 %v314_v21, %v314_v21 }
 0x1f1   :  { %297 = vmatmul.mubr.msk.bf16.vlgmr.msra.gmra.mrb[4].mxu0 %vm140_vm2, %v185_v22 }
 0x2c4   :  { %v246_v24 = vpop.f32.mrb[4].mxu0 }
 0x2c5   :  { %v247_v25 = vadd.f32 %v266_v23, %v246_v24  ;;  %v298_v26 = vpop.f32.mrb[5].mxu0 }
 0x2c6   :  { %v249_v27 = vpop.f32.mrb[6].mxu0 }
 0x2c7   :  { %252 = vst [vmem:[%s463_s7] sm:$0xff] %v247_v25  ;;  %v299_v28 = vpop.f32.mrb[7].mxu0 }
 0x2c8   :  { %257 = vsyncpa [#allocation3], 1 }
 0x2c9   :  { %258 = vsyncpa [#allocation5], 1 }

</bundles_post_ra>
